<compile_context>
chip_gen: v5e
topology: v5e:2x2
jax: 0.10.0
libtpu: 0.0.40
codegen_flags: <defaults>
</compile_context>

<pallas_src>
from functools import partial

import numpy as np
import jax
import jax.numpy as jnp
from jax.experimental import pallas as pl
from jax.experimental.pallas import tpu as pltpu

NUM_COMPONENTS = 6
NUM_FEATURES = 2

MAX_TILE_R = 256     # sublane rows per grid step (big-batch setting)
MAX_TILE_C = 2048    # lanes per grid step       -> 512K samples per step
MIN_TILE_R = 8
MIN_TILE_C = 128


def _gmm_kernel(mean_ref, qcoef_ref, logz_ref, w_ref, x_ref, out_ref):
    """One grid step handles a (TILE_R, TILE_C) slab of samples.

    mean_ref  : SMEM (K, D)          component means
    qcoef_ref : SMEM (K, D*(D+1)/2)  quadratic-form coefficients (with -0.5 and
                                     the symmetric 2*P_jk factor folded in)
    logz_ref  : SMEM (K,)            log normalizers -0.5*(logdet + D*log(2pi))
    w_ref     : SMEM (K,)            mixture weights (may be negative)
    x_ref     : VMEM (D, TILE_R, TILE_C)  features, batch on sublanes+lanes
    out_ref   : VMEM (TILE_R, TILE_C)     mixture density per sample
    """
    K = w_ref.shape[0]
    D = x_ref.shape[0]

    xs = [x_ref[j] for j in range(D)]              # D x (TILE_R, TILE_C)

    acc = None
    for i in range(K):                             # K, D tiny: fully unrolled
        # Centered quadratic form: -0.5 (x-m)^T P (x-m)  (better conditioned
        # than expanding into raw x monomials).
        d = [xs[j] - mean_ref[i, j] for j in range(D)]
        quad = None
        t = 0
        for j in range(D):
            for k in range(j, D):
                term = qcoef_ref[i, t] * (d[j] * d[k])
                quad = term if quad is None else quad + term
                t += 1
        logp = quad + logz_ref[i]
        # exp -> EUP slot (free w.r.t. the VALU-bound polynomial work).
        contrib = w_ref[i] * jnp.exp(logp)
        acc = contrib if acc is None else acc + contrib

    out_ref[...] = acc


def _build_params(means, covs):
    """Trace-time prep on K*D*D numbers only.

      log N(x; m, S) = -0.5 (x-m)^T P (x-m) - 0.5 (logdet S + D log 2pi)
    """
    means = means.astype(jnp.float32)
    covs = covs.astype(jnp.float32)
    K, D = means.shape

    prec = jnp.linalg.inv(covs)                               # (K, D, D)
    prec = 0.5 * (prec + jnp.swapaxes(prec, -1, -2))          # symmetrize
    _, logdet = jnp.linalg.slogdet(covs)                      # (K,)
    logz = -0.5 * (logdet + D * jnp.log(2.0 * jnp.pi))        # (K,)

    cols = []
    for j in range(D):
        for k in range(j, D):
            if j == k:
                cols.append(-0.5 * prec[:, j, j])             # d_j^2 coeff
            else:
                cols.append(-prec[:, j, k])                   # -0.5 * 2*P_jk
    qcoef = jnp.stack(cols, axis=1)                           # (K, T)
    return means, qcoef.astype(jnp.float32), logz.astype(jnp.float32)


def _choose_tile(n):
    """Pick a lane-dense (rows, lanes) tile from the batch size.

    Large batches get (256, 2048): ~12 MiB double-buffered VMEM footprint,
    which fits v5e's 16 MiB scoped default and v6e/v7x with room to spare.
    Small batches get a tile just large enough to cover n (min (8, 128)) so we
    don't pad/compute a huge block of garbage samples.
    """
    if n >= MAX_TILE_R * MAX_TILE_C:
        return MAX_TILE_R, MAX_TILE_C
    tc = MIN_TILE_C
    while tc < MAX_TILE_C and tc * MIN_TILE_R < n:
        tc *= 2
    rows_needed = -(-n // tc)
    tr = ((rows_needed + MIN_TILE_R - 1) // MIN_TILE_R) * MIN_TILE_R
    tr = max(MIN_TILE_R, min(MAX_TILE_R, tr))
    return tr, tc


@partial(jax.jit, static_argnames=("features_major",))
def gmm_prob_pallas(x, means, covs, weights, *, features_major=False):
    """Mixture density for every sample.

    x: (N, D) float32 (default, module semantics) or (D, N) if
       features_major=True (skips the wrapper transpose HBM pass).
    Returns (N,) float32.
    """
    if features_major:
        D, N = x.shape
    else:
        N, D = x.shape

    mean_p, qcoef, logz = _build_params(means, covs)
    weights = weights.astype(jnp.float32)

    tr, tc = _choose_tile(N)
    per_step = tr * tc
    n_pad = (-(-N // per_step)) * per_step

    if features_major:
        x_f = x.astype(jnp.float32)
    else:
        # TODO(synk): for very large sample-major batches this transpose is an
        # extra full-HBM pass; pass feature-major x (features_major=True) or
        # fuse the transpose into the upstream producer to remove it.
        x_f = x.astype(jnp.float32).T
    if n_pad != N:
        x_f = jnp.pad(x_f, ((0, 0), (0, n_pad - N)))
    rows = n_pad // tc
    x_f = x_f.reshape(D, rows, tc)

    grid = (rows // tr,)
    smem = pl.BlockSpec(memory_space=pltpu.MemorySpace.SMEM)

    out = pl.pallas_call(
        _gmm_kernel,
        out_shape=jax.ShapeDtypeStruct((rows, tc), jnp.float32),
        grid_spec=pltpu.PrefetchScalarGridSpec(
            num_scalar_prefetch=0,
            grid=grid,
            in_specs=[
                smem,                                          # means
                smem,                                          # quad coeffs
                smem,                                          # log normalizers
                smem,                                          # weights
                pl.BlockSpec((D, tr, tc), lambda r: (0, r, 0)),  # x
            ],
            out_specs=pl.BlockSpec((tr, tc), lambda r: (r, 0)),
        ),
        compiler_params=pltpu.CompilerParams(
            dimension_semantics=("parallel",)),
    )(mean_p, qcoef, logz, weights, x_f)

    out = out.reshape(-1)
    if n_pad != N:
        # Padded tail samples produce finite garbage densities; slice them off.
        out = out[:N]
    return out


def gmm_prob_reference(x, means, covs, weights):
    """Pure-JAX reference matching torch.distributions.MultivariateNormal."""
    prec = jnp.linalg.inv(covs)
    _, logdet = jnp.linalg.slogdet(covs)
    D = x.shape[1]
    diff = x[:, None, :] - means[None, :, :]                       # (N, K, D)
    quad = jnp.einsum("nkd,kde,nke->nk", diff, prec, diff)         # (N, K)
    logp = -0.5 * (quad + logdet[None, :] + D * jnp.log(2.0 * jnp.pi))
    return jnp.sum(weights[None, :] * jnp.exp(logp), axis=-1)


if __name__ == "__main__":
    key = jax.random.PRNGKey(0)
    k_means, k_cov, k_w, k_x = jax.random.split(key, 4)

    K, D, N = NUM_COMPONENTS, NUM_FEATURES, 8

    # Deterministic synthetic parameters (shapes from the module __init__).
    means = jax.random.normal(k_means, (K, D), dtype=jnp.float32)
    A = jax.random.normal(k_cov, (K, D, D), dtype=jnp.float32)
    covs = jnp.einsum("kij,klj->kil", A, A) + 0.5 * jnp.eye(D)[None]  # PSD
    # Raw randn weights (can be negative), matching the module; the kernel
    # keeps the explicit weight multiply so this stays exact.
    weights = jax.random.normal(k_w, (K,), dtype=jnp.float32)

    x = jax.random.normal(k_x, (N, D), dtype=jnp.float32)

    ref = gmm_prob_reference(x, means, covs, weights)

    # Default (sample-major) interface, matching the PyTorch module.
    out = jax.block_until_ready(gmm_prob_pallas(x, means, covs, weights))
    np.testing.assert_allclose(np.asarray(out), np.asarray(ref),
                               rtol=1e-4, atol=1e-5)

    # Feature-major fast path (no wrapper transpose HBM pass).
    out_fm = jax.block_until_ready(
        gmm_prob_pallas(x.T, means, covs, weights, features_major=True))
    np.testing.assert_allclose(np.asarray(out_fm), np.asarray(ref),
                               rtol=1e-4, atol=1e-5)

    print("KERNEL_OK")
</pallas_src>

<mosaic_0001>
module attributes {stable_mosaic.version = 11 : i64} {
  func.func @_gmm_kernel(%arg0: i32, %arg1: memref<6x2xf32, #tpu.memory_space<smem>>, %arg2: memref<6x3xf32, #tpu.memory_space<smem>>, %arg3: memref<6xf32, #tpu.memory_space<smem>>, %arg4: memref<6xf32, #tpu.memory_space<smem>>, %arg5: memref<2x8x128xf32, #tpu.memory_space<vmem>>, %arg6: memref<8x128xf32, #tpu.memory_space<vmem>>) attributes {dimension_semantics = [#tpu.dimension_semantics<parallel>], iteration_bounds = array<i64: 1>, scalar_prefetch = 0 : i64, scratch_operands = 0 : i64, tpu.core_type = #tpu.core_type<tc>, window_params = [{transform_indices = @transform_0, window_bounds = array<i64: 6, 2>}, {transform_indices = @transform_1, window_bounds = array<i64: 6, 3>}, {transform_indices = @transform_2, window_bounds = array<i64: 6>}, {transform_indices = @transform_3, window_bounds = array<i64: 6>}, {transform_indices = @transform_4, window_bounds = array<i64: 2, 8, 128>}, {transform_indices = @transform_5, window_bounds = array<i64: 8, 128>}]} {
    %c0 = arith.constant 0 : index
    %c0_0 = arith.constant 0 : index
    %c0_1 = arith.constant 0 : index
    %0 = vector.load %arg5[%c0, %c0_0, %c0_1] : memref<2x8x128xf32, #tpu.memory_space<vmem>>, vector<1x8x128xf32>
    %1 = vector.shape_cast %0 : vector<1x8x128xf32> to vector<8x128xf32>
    %c1 = arith.constant 1 : index
    %c0_2 = arith.constant 0 : index
    %c0_3 = arith.constant 0 : index
    %2 = vector.load %arg5[%c1, %c0_2, %c0_3] : memref<2x8x128xf32, #tpu.memory_space<vmem>>, vector<1x8x128xf32>
    %3 = vector.shape_cast %2 : vector<1x8x128xf32> to vector<8x128xf32>
    %c0_4 = arith.constant 0 : index
    %c0_5 = arith.constant 0 : index
    %4 = memref.load %arg1[%c0_4, %c0_5] : memref<6x2xf32, #tpu.memory_space<smem>>
    %5 = vector.broadcast %4 : f32 to vector<8x128xf32>
    %6 = arith.subf %1, %5 : vector<8x128xf32>
    %c0_6 = arith.constant 0 : index
    %c1_7 = arith.constant 1 : index
    %7 = memref.load %arg1[%c0_6, %c1_7] : memref<6x2xf32, #tpu.memory_space<smem>>
    %8 = vector.broadcast %7 : f32 to vector<8x128xf32>
    %9 = arith.subf %3, %8 : vector<8x128xf32>
    %c0_8 = arith.constant 0 : index
    %c0_9 = arith.constant 0 : index
    %10 = memref.load %arg2[%c0_8, %c0_9] : memref<6x3xf32, #tpu.memory_space<smem>>
    %11 = arith.mulf %6, %6 : vector<8x128xf32>
    %12 = vector.broadcast %10 : f32 to vector<8x128xf32>
    %13 = arith.mulf %12, %11 : vector<8x128xf32>
    %c0_10 = arith.constant 0 : index
    %c1_11 = arith.constant 1 : index
    %14 = memref.load %arg2[%c0_10, %c1_11] : memref<6x3xf32, #tpu.memory_space<smem>>
    %15 = arith.mulf %6, %9 : vector<8x128xf32>
    %16 = vector.broadcast %14 : f32 to vector<8x128xf32>
    %17 = arith.mulf %16, %15 : vector<8x128xf32>
    %18 = arith.addf %13, %17 : vector<8x128xf32>
    %c0_12 = arith.constant 0 : index
    %c2 = arith.constant 2 : index
    %19 = memref.load %arg2[%c0_12, %c2] : memref<6x3xf32, #tpu.memory_space<smem>>
    %20 = arith.mulf %9, %9 : vector<8x128xf32>
    %21 = vector.broadcast %19 : f32 to vector<8x128xf32>
    %22 = arith.mulf %21, %20 : vector<8x128xf32>
    %23 = arith.addf %18, %22 : vector<8x128xf32>
    %c0_13 = arith.constant 0 : index
    %24 = memref.load %arg3[%c0_13] : memref<6xf32, #tpu.memory_space<smem>>
    %25 = vector.broadcast %24 : f32 to vector<8x128xf32>
    %26 = arith.addf %23, %25 : vector<8x128xf32>
    %c0_14 = arith.constant 0 : index
    %27 = memref.load %arg4[%c0_14] : memref<6xf32, #tpu.memory_space<smem>>
    %28 = math.exp %26 : vector<8x128xf32>
    %29 = vector.broadcast %27 : f32 to vector<8x128xf32>
    %30 = arith.mulf %29, %28 : vector<8x128xf32>
    %c1_15 = arith.constant 1 : index
    %c0_16 = arith.constant 0 : index
    %31 = memref.load %arg1[%c1_15, %c0_16] : memref<6x2xf32, #tpu.memory_space<smem>>
    %32 = vector.broadcast %31 : f32 to vector<8x128xf32>
    %33 = arith.subf %1, %32 : vector<8x128xf32>
    %c1_17 = arith.constant 1 : index
    %c1_18 = arith.constant 1 : index
    %34 = memref.load %arg1[%c1_17, %c1_18] : memref<6x2xf32, #tpu.memory_space<smem>>
    %35 = vector.broadcast %34 : f32 to vector<8x128xf32>
    %36 = arith.subf %3, %35 : vector<8x128xf32>
    %c1_19 = arith.constant 1 : index
    %c0_20 = arith.constant 0 : index
    %37 = memref.load %arg2[%c1_19, %c0_20] : memref<6x3xf32, #tpu.memory_space<smem>>
    %38 = arith.mulf %33, %33 : vector<8x128xf32>
    %39 = vector.broadcast %37 : f32 to vector<8x128xf32>
    %40 = arith.mulf %39, %38 : vector<8x128xf32>
    %c1_21 = arith.constant 1 : index
    %c1_22 = arith.constant 1 : index
    %41 = memref.load %arg2[%c1_21, %c1_22] : memref<6x3xf32, #tpu.memory_space<smem>>
    %42 = arith.mulf %33, %36 : vector<8x128xf32>
    %43 = vector.broadcast %41 : f32 to vector<8x128xf32>
    %44 = arith.mulf %43, %42 : vector<8x128xf32>
    %45 = arith.addf %40, %44 : vector<8x128xf32>
    %c1_23 = arith.constant 1 : index
    %c2_24 = arith.constant 2 : index
    %46 = memref.load %arg2[%c1_23, %c2_24] : memref<6x3xf32, #tpu.memory_space<smem>>
    %47 = arith.mulf %36, %36 : vector<8x128xf32>
    %48 = vector.broadcast %46 : f32 to vector<8x128xf32>
    %49 = arith.mulf %48, %47 : vector<8x128xf32>
    %50 = arith.addf %45, %49 : vector<8x128xf32>
    %c1_25 = arith.constant 1 : index
    %51 = memref.load %arg3[%c1_25] : memref<6xf32, #tpu.memory_space<smem>>
    %52 = vector.broadcast %51 : f32 to vector<8x128xf32>
    %53 = arith.addf %50, %52 : vector<8x128xf32>
    %c1_26 = arith.constant 1 : index
    %54 = memref.load %arg4[%c1_26] : memref<6xf32, #tpu.memory_space<smem>>
    %55 = math.exp %53 : vector<8x128xf32>
    %56 = vector.broadcast %54 : f32 to vector<8x128xf32>
    %57 = arith.mulf %56, %55 : vector<8x128xf32>
    %58 = arith.addf %30, %57 : vector<8x128xf32>
    %c2_27 = arith.constant 2 : index
    %c0_28 = arith.constant 0 : index
    %59 = memref.load %arg1[%c2_27, %c0_28] : memref<6x2xf32, #tpu.memory_space<smem>>
    %60 = vector.broadcast %59 : f32 to vector<8x128xf32>
    %61 = arith.subf %1, %60 : vector<8x128xf32>
    %c2_29 = arith.constant 2 : index
    %c1_30 = arith.constant 1 : index
    %62 = memref.load %arg1[%c2_29, %c1_30] : memref<6x2xf32, #tpu.memory_space<smem>>
    %63 = vector.broadcast %62 : f32 to vector<8x128xf32>
    %64 = arith.subf %3, %63 : vector<8x128xf32>
    %c2_31 = arith.constant 2 : index
    %c0_32 = arith.constant 0 : index
    %65 = memref.load %arg2[%c2_31, %c0_32] : memref<6x3xf32, #tpu.memory_space<smem>>
    %66 = arith.mulf %61, %61 : vector<8x128xf32>
    %67 = vector.broadcast %65 : f32 to vector<8x128xf32>
    %68 = arith.mulf %67, %66 : vector<8x128xf32>
    %c2_33 = arith.constant 2 : index
    %c1_34 = arith.constant 1 : index
    %69 = memref.load %arg2[%c2_33, %c1_34] : memref<6x3xf32, #tpu.memory_space<smem>>
    %70 = arith.mulf %61, %64 : vector<8x128xf32>
    %71 = vector.broadcast %69 : f32 to vector<8x128xf32>
    %72 = arith.mulf %71, %70 : vector<8x128xf32>
    %73 = arith.addf %68, %72 : vector<8x128xf32>
    %c2_35 = arith.constant 2 : index
    %c2_36 = arith.constant 2 : index
    %74 = memref.load %arg2[%c2_35, %c2_36] : memref<6x3xf32, #tpu.memory_space<smem>>
    %75 = arith.mulf %64, %64 : vector<8x128xf32>
    %76 = vector.broadcast %74 : f32 to vector<8x128xf32>
    %77 = arith.mulf %76, %75 : vector<8x128xf32>
    %78 = arith.addf %73, %77 : vector<8x128xf32>
    %c2_37 = arith.constant 2 : index
    %79 = memref.load %arg3[%c2_37] : memref<6xf32, #tpu.memory_space<smem>>
    %80 = vector.broadcast %79 : f32 to vector<8x128xf32>
    %81 = arith.addf %78, %80 : vector<8x128xf32>
    %c2_38 = arith.constant 2 : index
    %82 = memref.load %arg4[%c2_38] : memref<6xf32, #tpu.memory_space<smem>>
    %83 = math.exp %81 : vector<8x128xf32>
    %84 = vector.broadcast %82 : f32 to vector<8x128xf32>
    %85 = arith.mulf %84, %83 : vector<8x128xf32>
    %86 = arith.addf %58, %85 : vector<8x128xf32>
    %c3 = arith.constant 3 : index
    %c0_39 = arith.constant 0 : index
    %87 = memref.load %arg1[%c3, %c0_39] : memref<6x2xf32, #tpu.memory_space<smem>>
    %88 = vector.broadcast %87 : f32 to vector<8x128xf32>
    %89 = arith.subf %1, %88 : vector<8x128xf32>
    %c3_40 = arith.constant 3 : index
    %c1_41 = arith.constant 1 : index
    %90 = memref.load %arg1[%c3_40, %c1_41] : memref<6x2xf32, #tpu.memory_space<smem>>
    %91 = vector.broadcast %90 : f32 to vector<8x128xf32>
    %92 = arith.subf %3, %91 : vector<8x128xf32>
    %c3_42 = arith.constant 3 : index
    %c0_43 = arith.constant 0 : index
    %93 = memref.load %arg2[%c3_42, %c0_43] : memref<6x3xf32, #tpu.memory_space<smem>>
    %94 = arith.mulf %89, %89 : vector<8x128xf32>
    %95 = vector.broadcast %93 : f32 to vector<8x128xf32>
    %96 = arith.mulf %95, %94 : vector<8x128xf32>
    %c3_44 = arith.constant 3 : index
    %c1_45 = arith.constant 1 : index
    %97 = memref.load %arg2[%c3_44, %c1_45] : memref<6x3xf32, #tpu.memory_space<smem>>
    %98 = arith.mulf %89, %92 : vector<8x128xf32>
    %99 = vector.broadcast %97 : f32 to vector<8x128xf32>
    %100 = arith.mulf %99, %98 : vector<8x128xf32>
    %101 = arith.addf %96, %100 : vector<8x128xf32>
    %c3_46 = arith.constant 3 : index
    %c2_47 = arith.constant 2 : index
    %102 = memref.load %arg2[%c3_46, %c2_47] : memref<6x3xf32, #tpu.memory_space<smem>>
    %103 = arith.mulf %92, %92 : vector<8x128xf32>
    %104 = vector.broadcast %102 : f32 to vector<8x128xf32>
    %105 = arith.mulf %104, %103 : vector<8x128xf32>
    %106 = arith.addf %101, %105 : vector<8x128xf32>
    %c3_48 = arith.constant 3 : index
    %107 = memref.load %arg3[%c3_48] : memref<6xf32, #tpu.memory_space<smem>>
    %108 = vector.broadcast %107 : f32 to vector<8x128xf32>
    %109 = arith.addf %106, %108 : vector<8x128xf32>
    %c3_49 = arith.constant 3 : index
    %110 = memref.load %arg4[%c3_49] : memref<6xf32, #tpu.memory_space<smem>>
    %111 = math.exp %109 : vector<8x128xf32>
    %112 = vector.broadcast %110 : f32 to vector<8x128xf32>
    %113 = arith.mulf %112, %111 : vector<8x128xf32>
    %114 = arith.addf %86, %113 : vector<8x128xf32>
    %c4 = arith.constant 4 : index
    %c0_50 = arith.constant 0 : index
    %115 = memref.load %arg1[%c4, %c0_50] : memref<6x2xf32, #tpu.memory_space<smem>>
    %116 = vector.broadcast %115 : f32 to vector<8x128xf32>
    %117 = arith.subf %1, %116 : vector<8x128xf32>
    %c4_51 = arith.constant 4 : index
    %c1_52 = arith.constant 1 : index
    %118 = memref.load %arg1[%c4_51, %c1_52] : memref<6x2xf32, #tpu.memory_space<smem>>
    %119 = vector.broadcast %118 : f32 to vector<8x128xf32>
    %120 = arith.subf %3, %119 : vector<8x128xf32>
    %c4_53 = arith.constant 4 : index
    %c0_54 = arith.constant 0 : index
    %121 = memref.load %arg2[%c4_53, %c0_54] : memref<6x3xf32, #tpu.memory_space<smem>>
    %122 = arith.mulf %117, %117 : vector<8x128xf32>
    %123 = vector.broadcast %121 : f32 to vector<8x128xf32>
    %124 = arith.mulf %123, %122 : vector<8x128xf32>
    %c4_55 = arith.constant 4 : index
    %c1_56 = arith.constant 1 : index
    %125 = memref.load %arg2[%c4_55, %c1_56] : memref<6x3xf32, #tpu.memory_space<smem>>
    %126 = arith.mulf %117, %120 : vector<8x128xf32>
    %127 = vector.broadcast %125 : f32 to vector<8x128xf32>
    %128 = arith.mulf %127, %126 : vector<8x128xf32>
    %129 = arith.addf %124, %128 : vector<8x128xf32>
    %c4_57 = arith.constant 4 : index
    %c2_58 = arith.constant 2 : index
    %130 = memref.load %arg2[%c4_57, %c2_58] : memref<6x3xf32, #tpu.memory_space<smem>>
    %131 = arith.mulf %120, %120 : vector<8x128xf32>
    %132 = vector.broadcast %130 : f32 to vector<8x128xf32>
    %133 = arith.mulf %132, %131 : vector<8x128xf32>
    %134 = arith.addf %129, %133 : vector<8x128xf32>
    %c4_59 = arith.constant 4 : index
    %135 = memref.load %arg3[%c4_59] : memref<6xf32, #tpu.memory_space<smem>>
    %136 = vector.broadcast %135 : f32 to vector<8x128xf32>
    %137 = arith.addf %134, %136 : vector<8x128xf32>
    %c4_60 = arith.constant 4 : index
    %138 = memref.load %arg4[%c4_60] : memref<6xf32, #tpu.memory_space<smem>>
    %139 = math.exp %137 : vector<8x128xf32>
    %140 = vector.broadcast %138 : f32 to vector<8x128xf32>
    %141 = arith.mulf %140, %139 : vector<8x128xf32>
    %142 = arith.addf %114, %141 : vector<8x128xf32>
    %c5 = arith.constant 5 : index
    %c0_61 = arith.constant 0 : index
    %143 = memref.load %arg1[%c5, %c0_61] : memref<6x2xf32, #tpu.memory_space<smem>>
    %144 = vector.broadcast %143 : f32 to vector<8x128xf32>
    %145 = arith.subf %1, %144 : vector<8x128xf32>
    %c5_62 = arith.constant 5 : index
    %c1_63 = arith.constant 1 : index
    %146 = memref.load %arg1[%c5_62, %c1_63] : memref<6x2xf32, #tpu.memory_space<smem>>
    %147 = vector.broadcast %146 : f32 to vector<8x128xf32>
    %148 = arith.subf %3, %147 : vector<8x128xf32>
    %c5_64 = arith.constant 5 : index
    %c0_65 = arith.constant 0 : index
    %149 = memref.load %arg2[%c5_64, %c0_65] : memref<6x3xf32, #tpu.memory_space<smem>>
    %150 = arith.mulf %145, %145 : vector<8x128xf32>
    %151 = vector.broadcast %149 : f32 to vector<8x128xf32>
    %152 = arith.mulf %151, %150 : vector<8x128xf32>
    %c5_66 = arith.constant 5 : index
    %c1_67 = arith.constant 1 : index
    %153 = memref.load %arg2[%c5_66, %c1_67] : memref<6x3xf32, #tpu.memory_space<smem>>
    %154 = arith.mulf %145, %148 : vector<8x128xf32>
    %155 = vector.broadcast %153 : f32 to vector<8x128xf32>
    %156 = arith.mulf %155, %154 : vector<8x128xf32>
    %157 = arith.addf %152, %156 : vector<8x128xf32>
    %c5_68 = arith.constant 5 : index
    %c2_69 = arith.constant 2 : index
    %158 = memref.load %arg2[%c5_68, %c2_69] : memref<6x3xf32, #tpu.memory_space<smem>>
    %159 = arith.mulf %148, %148 : vector<8x128xf32>
    %160 = vector.broadcast %158 : f32 to vector<8x128xf32>
    %161 = arith.mulf %160, %159 : vector<8x128xf32>
    %162 = arith.addf %157, %161 : vector<8x128xf32>
    %c5_70 = arith.constant 5 : index
    %163 = memref.load %arg3[%c5_70] : memref<6xf32, #tpu.memory_space<smem>>
    %164 = vector.broadcast %163 : f32 to vector<8x128xf32>
    %165 = arith.addf %162, %164 : vector<8x128xf32>
    %c5_71 = arith.constant 5 : index
    %166 = memref.load %arg4[%c5_71] : memref<6xf32, #tpu.memory_space<smem>>
    %167 = math.exp %165 : vector<8x128xf32>
    %168 = vector.broadcast %166 : f32 to vector<8x128xf32>
    %169 = arith.mulf %168, %167 : vector<8x128xf32>
    %170 = arith.addf %142, %169 : vector<8x128xf32>
    %c0_72 = arith.constant 0 : index
    %c0_73 = arith.constant 0 : index
    %171 = vector.load %arg6[%c0_72, %c0_73] : memref<8x128xf32, #tpu.memory_space<vmem>>, vector<8x128xf32>
    tpu.vector_store %arg6[%c0_72, %c0_73], %170 {strides = array<i32>} : memref<8x128xf32, #tpu.memory_space<vmem>>, vector<8x128xf32>,
    return
  }
  func.func @transform_0(%arg0: i32) -> (i32, i32) {
    %c0_i32 = arith.constant 0 : i32
    %c0_i32_0 = arith.constant 0 : i32
    %c0_i32_1 = arith.constant 0 : i32
    return %c0_i32, %c0_i32_0 : i32, i32
  }
  func.func @transform_1(%arg0: i32) -> (i32, i32) {
    %c0_i32 = arith.constant 0 : i32
    %c0_i32_0 = arith.constant 0 : i32
    %c0_i32_1 = arith.constant 0 : i32
    return %c0_i32, %c0_i32_0 : i32, i32
  }
  func.func @transform_2(%arg0: i32) -> i32 {
    %c0_i32 = arith.constant 0 : i32
    %c0_i32_0 = arith.constant 0 : i32
    return %c0_i32 : i32
  }
  func.func @transform_3(%arg0: i32) -> i32 {
    %c0_i32 = arith.constant 0 : i32
    %c0_i32_0 = arith.constant 0 : i32
    return %c0_i32 : i32
  }
  func.func @transform_4(%arg0: i32) -> (i32, i32, i32) {
    %c0_i32 = arith.constant 0 : i32
    %c0_i32_0 = arith.constant 0 : i32
    %c0_i32_1 = arith.constant 0 : i32
    return %c0_i32, %arg0, %c0_i32_0 : i32, i32, i32
  }
  func.func @transform_5(%arg0: i32) -> (i32, i32) {
    %c0_i32 = arith.constant 0 : i32
    %c0_i32_0 = arith.constant 0 : i32
    return %arg0, %c0_i32 : i32, i32
  }
}

</mosaic_0001>

<bundles_post_ra>
// kernel: custom-call.11
= control target key start
LH: loop header
LB: loop body
LE: loop exit
PB: predicated region body
PF: predicated region fallthrough
CT: control target
= control target key end

     0   :  { %5 = vsyncpa [#allocation5], 0  ;;  %s896_s0 = inlined_call_operand.vmem [shape: f32[6,2,2], index: 0, kind: input, shape index: {}]   ;;  %s897_s1 = inlined_call_operand.vmem [shape: f32[6,2,2], index: 1, kind: output, shape index: {0}]   ;;  %s898_s2 = inlined_call_operand.hbm [shape: s32[6,2], index: 2, kind: output, shape index: {1}]   ;;  %s899_s3 = inlined_call_operand.vmem [shape: s32[6,2], index: 3, kind: output, shape index: {2}]  }
   0x1   :  { %7 = vsyncpa [#allocation5 + $0x1], 0  ;;  %s723_s12 = smov 0   ;;  %s725_s13 = smov 0  }
   0x2   :  { %s727_s14 = smov 0   ;;  %s729_s15 = smov 0  }
   0x3 LB: > { %s744_s16 = sadd.s32 4294967295, %s696_s15   ;;  %s559_s17 = sadd.s32 4294967294, %s696_s15   ;;  %s696_s15 = sphi %s729_s15, %s907_s15   ;;  %s692_s14 = sphi %s727_s14, %s906_s14   ;;  %s688_s13 = sphi %s725_s13, %s905_s13   ;;  %s684_s12 = sphi %s723_s12, %s904_s12  }
   0x4   : > { %s748_s18 = sadd.s32 1, %s696_s15   ;;  %s17_s19 = sshrl.u32 %s696_s15, 3 }
   0x5   : > { %s18_s20 = sshrl.u32 %s748_s18, 3  ;;  %s22_s21 = sadd.s32 1, %s692_s14 }
   0x6   : > { %s19_s22 = ssub.s32 %s17_s19, %s18_s20  ;;  %p32_p0 = scmp.ne.s32.totalorder %s692_s14, %s688_s13 }
   0x7   : > { %p20_p1 = scmp.eq.s32.totalorder %s19_s22, 0  ;;  %p33_p2 = scmp.eq.s32.totalorder %s744_s16, 5 }
   0x8   : > { %p38_p3 = scmp.ne.s32.totalorder %s688_s13, %s684_s12  ;;  %p39_p4 = scmp.eq.s32.totalorder %s559_s17, 5 }
   0x9   : > { %s759_s23 = scalar_select %p20_p1, %s692_s14, %s22_s21  }
   0xa   : > { %p761_p5 = por %p33_p2, %p32_p0  ;;  %p765_p6 = por %p39_p4, %p38_p3 }
   0xb   : > { %p561_p7 = scmp.ge.s32.totalorder %s696_s15, 6 }
   0xc   : > { %s85_s26 = sand.u32 (!%p561_p7), 1, %s696_s15   ;;  %s563_s27 = sshll.u32 (!%p561_p7), %s696_s15, 1 }
   0xd   : > { %83 = sbr.rel (%p561_p7) target bundleno = 20 (0x14), region = 16  ;;  %s562_s28 = sshll.u32 (!%p561_p7), %s85_s26, 1 }
   0xe   : > { %s89_s4 = scalar_lea.vmem (!%p561_p7), %s896_s0, %s563_s27  ;;  %s87_s5 = scalar_lea.vmem (!%p561_p7), [#allocation1], %s562_s28 }
  0x12   : > { %v106_v0 = vld [vmem:[%s89_s4] sm:$0x3] }
  0x13   : > { %107 = vst [vmem:[%s87_s5] sm:$0x3] %v106_v0 }
  0x14 PF: > { %p564_p8 = scmp.ge.s32.totalorder %s696_s15, 1  ;;  %p124_p9 = scmp.lt.s32.totalorder %s696_s15, 7 }
  0x16   : > { %p125_p10 = pnand %p564_p8, %p124_p9 }
  0x18   : > { %128 = sbr.rel (%p125_p10) target bundleno = 476 (0x1dc), region = 50 }
  0x1d   : > { %s135_s6 = sand.u32 1, %s744_s16   ;;  %s146_s7 = sand.u32 1, %s688_s13   ;;  %v168_v1 = vlaneseq  ;;  %v702_v4 = vmov 0  }
  0x1e   : > { %s779_s8 = sshll.u32 %s135_s6, 1  ;;  %s783_s9 = sshll.u32 %s146_s7, 3 }
  0x1f   : > { %v786_v2 = vshrl.u32 %v168_v1, 7  ;;  %s137_s10 = scalar_lea.vmem [#allocation1], %s779_s8  ;;  %s163_s11 = sand.u32 7, %s744_s16  }
  0x20   : > { %v157_v3 = vld [vmem:[%s137_s10] sm:$0x3]  ;;  %s148_s17 = scalar_lea.vmem [#allocation4], %s783_s9  ;;  %s900_s20 = scalar_lea.vmem [#allocation6], %s783_s9 }
  0x21   : > { %158 = vst [vmem:[#allocation0] sm:$0x3] %v157_v3  ;;  %s793_s19 = scalar_lea.vmem %s148_s17, %s163_s11 [#allocation4]  ;;  %s798_s21 = scalar_lea.vmem %s900_s20, %s163_s11 [#allocation6] }
  0x22   : > { %172 = vst [vmem:[#allocation7] sm:$0xff] %v786_v2  ;;  %s141_s22 = scalar_lea.vmem [#allocation3], %s779_s8  ;;  %s803_s26 = smov 0  }
  0x23   : > { %167 = vst [vmem:[%s793_s19] sm:$0x1] %v702_v4 }
  0x28   : > { %v161_v5 = vld [vmem:[#allocation0] sm:$0xff] }
  0x29   : > { %162 = vst [vmem:[#allocation2] sm:$0xff] %v161_v5 }
  0x2a LB: >> { %vm188_vm0 = vcmp.lt.s32.totalorder %v786_v2, 2  ;;  %v810_v8 = vstv %s700_s26  ;;  %s229_s27 = ssub.s32 128, %s700_s26  ;;  %v235_v39 = vand.u32 127, %v168_v1  ;;  %s241_s28 = scalar_lea.vmem [#allocation2], %s700_s26  ;;  %v238_v42 = vld [vmem:[%s793_s19] ss:$0 sm:$0xff]  ;;  %s700_s26 = sphi %s803_s26, %s178_s26  }
  0x2b   : >> { %vm187_vm1 = vcmp.ge.s32.totalorder %v786_v2, %v810_v8  ;;  %s247_s4 = scalar_lea.vmem [#allocation7], %s700_s26  ;;  %vm267_vm14 = vcmp.gt.s32.totalorder %v786_v2, %v810_v8  ;;  %s178_s26 = sadd.s32 1, %s700_s26  }
  0x2c   : >> { %vm189_vm3 = vmand %vm187_vm1, %vm188_vm0  ;;  %vm236_vm12 = vcmp.eq.s32.totalorder %v235_v39, %v810_v8  ;;  %v249_v44 = vld [vmem:[%s247_s4] ss:$0 sm:$0xff]  ;;  %p175_p11 = scmp.ge.s32.totalorder %s178_s26, 2  }
  0x2d   : > { %s397_s6 = sshrl.u32 (%p175_p11), %s744_s16, 3  ;;  %s650_s20 = scalar_lea.hbm (%p175_p11), %s898_s2, 8 }
  0x2e   : > { %s842_s10 = sshll.u32 (%p175_p11), %s397_s6, 3 }
  0x30   : >> { %v183_v6 = vld [vmem:[#allocation2] sm:$0xff]  ;;  %v243_v40 = vld [vmem:[%s241_s28] ss:$0 sm:$0xff] }
  0x31   : >> { %v184_v7 = vand.u32 2147483647, %v183_v6 }
  0x33   : >> { %vm569_vm2 = vcmp.gt.f32.partialorder %v184_v7, -inf }
  0x34   : >> { %vm191_vm4 = vmand %vm189_vm3, %vm569_vm2 }
  0x35   : >> { %v192_v9 = vsel %vm191_vm4, %v786_v2, %v810_v8  ;;  %v193_v10 = vsel %vm191_vm4, %v184_v7, -inf  ;;  %vm284_vm4 = vmand %vm267_vm14, %vm236_vm12 }
  0x36   : >> { %v194_v11 = vrot.slane %v193_v10, 1  ;;  %v195_v12 = vrot.slane %v192_v9, 1 }
  0x38   : >> { %vm196_vm5 = vcmp.ge.f32.partialorder %v194_v11, %v193_v10  ;;  %v199_v13 = vrot.slane %v194_v11, 1  ;;  %v200_v14 = vrot.slane %v195_v12, 1 }
  0x39   : >> { %v197_v15 = vsel %vm196_vm5, %v194_v11, %v193_v10  ;;  %v198_v16 = vsel %vm196_vm5, %v195_v12, %v192_v9  ;;  %vm259_vm5 = vcmp.gt.s32.totalorder %v235_v39, %v810_v8 }
  0x3a   : >> { %vm201_vm6 = vcmp.ge.f32.partialorder %v199_v13, %v197_v15  ;;  %v204_v17 = vrot.slane %v199_v13, 1  ;;  %v205_v18 = vrot.slane %v200_v14, 1 }
  0x3b   : >> { %v202_v19 = vsel %vm201_vm6, %v199_v13, %v197_v15  ;;  %v203_v20 = vsel %vm201_vm6, %v200_v14, %v198_v16 }
  0x3c   : >> { %vm206_vm7 = vcmp.ge.f32.partialorder %v204_v17, %v202_v19  ;;  %v209_v21 = vrot.slane %v204_v17, 1  ;;  %v210_v22 = vrot.slane %v205_v18, 1 }
  0x3d   : >> { %v207_v23 = vsel %vm206_vm7, %v204_v17, %v202_v19  ;;  %v208_v24 = vsel %vm206_vm7, %v205_v18, %v203_v20 }
  0x3e   : >> { %vm211_vm8 = vcmp.ge.f32.partialorder %v209_v21, %v207_v23  ;;  %v214_v25 = vrot.slane %v209_v21, 1  ;;  %v215_v26 = vrot.slane %v210_v22, 1 }
  0x3f   : >> { %v212_v27 = vsel %vm211_vm8, %v209_v21, %v207_v23  ;;  %v213_v28 = vsel %vm211_vm8, %v210_v22, %v208_v24 }
  0x40   : >> { %vm216_vm9 = vcmp.ge.f32.partialorder %v214_v25, %v212_v27  ;;  %v219_v29 = vrot.slane %v214_v25, 1  ;;  %v220_v30 = vrot.slane %v215_v26, 1 }
  0x41   : >> { %v217_v31 = vsel %vm216_vm9, %v214_v25, %v212_v27  ;;  %v218_v32 = vsel %vm216_vm9, %v215_v26, %v213_v28 }
  0x42   : >> { %vm221_vm10 = vcmp.ge.f32.partialorder %v219_v29, %v217_v31  ;;  %v224_v33 = vrot.slane %v219_v29, 1  ;;  %v225_v34 = vrot.slane %v220_v30, 1 }
  0x43   : >> { %v222_v35 = vsel %vm221_vm10, %v219_v29, %v217_v31  ;;  %v223_v36 = vsel %vm221_vm10, %v220_v30, %v218_v32 }
  0x44   : >> { %vm226_vm11 = vcmp.ge.f32.partialorder %v224_v33, %v222_v35 }
  0x45   : >> { %v228_v37 = vsel %vm226_vm11, %v225_v34, %v223_v36 }
  0x46   : >> { %230 = vrot.lane.b32.xlu0 %v228_v37, %s229_s27 }
  0xb8   : >> { %v231_v38 = vpop.permute.xlu0 %230 }
  0xb9   : >> { %578 = vpush %v231_v38 }
  0xea   : >> { %s579_s29 = spop %578 }
  0xeb   : >> { %v237_v41 = vstv %s579_s29  ;;  %s242_s30 = scalar_lea.vmem [#allocation2], %s579_s29  ;;  %s248_s5 = scalar_lea.vmem [#allocation7], %s579_s29 }
  0xec   : >> { %v244_v43 = vld [vmem:[%s242_s30] ss:$0 sm:$0xff]  ;;  %v239_v46 = vsel %vm236_vm12, %v237_v41, %v238_v42  ;;  %s403_s29 = sshll.u32 (%p175_p11), %s148_s17, 4  ;;  %s404_s29 = int_to_ptr.vmem [resolvable:$true] %s403_s29 }
  0xed   : >> { %v250_v45 = vld [vmem:[%s248_s5] ss:$0 sm:$0xff]  ;;  %245 = vst [vmem:[%s242_s30] sm:$0x1] %v243_v40  ;;  %vm253_vm13 = vcmp.ne.f32.partialorder %v244_v43, 0.0  ;;  %v260_v62 = vsel %vm259_vm5, %v244_v43, 0.0 }
  0xee   : >> { %246 = vst [vmem:[%s241_s28] sm:$0x1] %v244_v43  ;;  %vm254_vm15 = vmand %vm236_vm12, %vm253_vm13  ;;  %s401_s28 = scalar_lea.hbm (%p175_p11), %s898_s2, %s842_s10 }
  0xef   : >> { %251 = vst [vmem:[%s248_s5] sm:$0x1] %v249_v44  ;;  %v255_v47 = vsel %vm254_vm15, %v244_v43, 1.0  ;;  %s405_s30 = sshll.u32 (%p175_p11), %s401_s28, 4  ;;  %s406_s30 = int_to_ptr.hbm [resolvable:$true] %s405_s30 }
  0xf0   : >> { %252 = vst [vmem:[%s247_s4] sm:$0x1] %v250_v45  ;;  %v268_v48 = vsel %vm267_vm14, %v255_v47, 1.0  ;;  %s644_s26 = sshra.s32 (%p175_p11), %s406_s30, 4  ;;  %s645_s26 = int_to_ptr.hbm [resolvable:$true] %s644_s26 }
  0xf1   : >> { %628 = vrcp.f32 %v268_v48  ;;  %240 = vst [vmem:[%s793_s19] sm:$0x1] %v239_v46  ;;  %v280_v52 = vand.u32 2147483648, %v268_v48  ;;  %v278_v54 = vand.u32 2147483647, %v268_v48  ;;  %vm274_vm1 = vweird.f32 %v268_v48  ;;  %s351_s19 = scalar_lea.sflag (%p175_p11), [#allocation5], %s146_s7  ;;  %s646_s4 = scalar_lea.hbm (%p175_p11), %s645_s26, 8 }
  0xf2   : > { %p647_p12 = scmp.ne.s32.totalorder (%p175_p11), %s645_s26, %s646_s4  ;;  %p651_p1 = scmp.lt.s32.totalorder (%p175_p11), %s645_s26, %s898_s2 }
  0xf3   : >> { %v281_v56 = vor.u32 1.1754944e-38, %v280_v52  ;;  %vm279_vm3 = vcmp.eq.f32.partialorder %v278_v54, 8.507059e+37  ;;  %p652_p2 = scmp.lt.s32.totalorder (%p175_p11), %s650_s20, %s646_s4 }
  0xf4   : > { %p648_p13 = pnand (%p175_p11), %p647_p12, %p761_p5 }
  0xf5   : >> { %v264_v58 = vld [vmem:[#allocation2] sm:$0xff]  ;;  %p653_p3 = por (%p175_p11), %p652_p2, %p651_p1 }
  0xf6   : > { %p649_p0 = pneg (%p175_p11), %p648_p13 }
  0xf7   : >> { %v629_v49 = vpop.eup %628  ;;  %v291_v4 = vld [vmem:[#allocation7] sm:$0xff] (%p175_p11) }
  0xf8   : >> { %v270_v50 = vmul.f32 %v629_v49, %v268_v48  ;;  %vm275_vm0 = vweird.f32 %v629_v49  ;;  %p654_p4 = pnand (%p175_p11), %p653_p3, %p649_p0 }
  0xf9   : >> { %vm276_vm2 = vmor %vm274_vm1, %vm275_vm0 }
  0xfa   : >> { %v271_v51 = vsub.f32 1.0, %v270_v50 }
  0xfc   : >> { %v272_v53 = vmul.f32 %v629_v49, %v271_v51 }
  0xfe   : >> { %v273_v55 = vadd.f32 %v629_v49, %v272_v53 }
 0x100   : >> { %v277_v57 = vsel %vm276_vm2, %v629_v49, %v273_v55 }
 0x101   : >> { %v282_v59 = vsel %vm279_vm3, %v281_v56, %v277_v57 }
 0x102   : >> { %v283_v60 = vmul.f32 %v282_v59, %v264_v58 }
 0x104   : >> { %v285_v61 = vsel %vm284_vm4, %v283_v60, 0.0 }
 0x105   : >> { %286 = vadd.xlane.f32.xlu0 %v285_v61 }
 0x12e   : > { %307 = vxpose.xlu0.b32.start.end [1/1] (short) (narrow) (%p175_p11), %v291_v4, 8 }
 0x178   : >> { %v287_v63 = vpop.xlane.xlu0 %286 }
 0x179   : >> { %v288_v0 = vmul.f32 %v287_v63, %v260_v62  ;;  %177 = sbr.rel (!%p175_p11) target bundleno = 42 (0x2a), region = 206 }
 0x17b   : >> { %v289_v3 = vsub.f32 %v283_v60, %v288_v0 }
 0x17d   : >> { %290 = vst [vmem:[#allocation2] sm:$0xff] %v289_v3 }
 0x17e   : > { %657 = shalt.err (!%p654_p4)
}
 0x17f   : > { %580 = dma.vmem_to_hbm [thread:$0]  (%p761_p5), %s404_s29, 128, %s406_s30, %s351_s19  }
 0x180   : > { %s573_s7 = sshll.u32 %s744_s16, 1  ;;  %s414_s29 = scalar_lea.vmem (%p761_p5), %s899_s3, %s842_s10 }
 0x181   : > { %s360_s5 = scalar_lea.vmem %s897_s1, %s573_s7  ;;  %s903_s30 = scalar_lea.vmem (%p761_p5), [#allocation6], %s783_s9 }
 0x184   : > { %v342_v1 = vld [vmem:[#allocation2] sm:$0x3] }
 0x185   : > { %345 = vst [vmem:[%s141_s22] sm:$0x3] %v342_v1 }
 0x18c   : > { %v377_v2 = vld [vmem:[%s141_s22] sm:$0x3] }
 0x18d   : > { %378 = vst [vmem:[%s360_s5] sm:$0x3] %v377_v2 }
 0x1cf   : > { %411 = sbr.rel (!%p761_p5) target bundleno = 476 (0x1dc), region = 96 }
 0x1d2   : > { %v323_v5 = vpop.trf.xlu0 }
 0x1d3   : > { %339 = vst [vmem:[%s798_s21] sm:$0x1] %v323_v5 }
 0x1da   : > { %v443_v6 = vld [vmem:[%s903_s30] sm:$0xff] }
 0x1db   : > { %444 = vst [vmem:[%s414_s29] sm:$0xff] %v443_v6 }
 0x1dc PF: > { %p586_p7 = scmp.ge.s32.totalorder %s696_s15, 2  ;;  %s460_s16 = sand.u32 1, %s684_s12  }
 0x1dd   : > { %s461_s24 = scalar_lea.sflag [#allocation5], %s460_s16 }
 0x1de   : > { %p583_p8 = pnand %p586_p7, %p765_p6 }
 0x1e0   : > { %p584_p9 = pneg %p583_p8 }
 0x1e2   : > { %679 = dma.done.wait (%p584_p9), %s461_s24, 128  }
 0x1e3   : > { %681 = vsyncadd (%p584_p9), %s461_s24, 4294967168  ;;  %p10_p5 = scmp.ge.s32.totalorder %s748_s18, 8   ;;  %s904_s12 = smov %s688_s13 }
 0x1e4   : > { %s905_s13 = smov %s692_s14  ;;  %s906_s14 = smov %s759_s23 }
 0x1e5   : > { %s907_s15 = smov %s748_s18  ;;  %12 = sbr.rel (!%p10_p5) target bundleno = 3 (0x3), region = 217 }
 0x1ea   :  { %474 = vsyncpa [#allocation5], 1 }
 0x1eb   :  { %476 = vsyncpa [#allocation5 + $0x1], 1 }

// kernel: custom-call.13
= control target key start
LH: loop header
LB: loop body
LE: loop exit
PB: predicated region body
PF: predicated region fallthrough
CT: control target
= control target key end

     0   :  { %s363_s6 = smov 0   ;;  %s365_s7 = smov 0   ;;  %s412_s0 = inlined_call_operand.vmem [shape: f32[6,1,2,2], index: 0, kind: input, shape index: {}]   ;;  %s413_s1 = inlined_call_operand.vmem [shape: f32[6,1,2,2], index: 1, kind: output, shape index: {}]  }
   0x1   :  { %s367_s8 = smov 0  }
   0x2 LB: > { %s289_s9 = sadd.s32 4294967295, %s350_s8   ;;  %s33_s10 = sadd.s32 1, %s346_s7  ;;  %s350_s8 = sphi %s367_s8, %s7_s8   ;;  %s346_s7 = sphi %s365_s7, %s415_s7   ;;  %s342_s6 = sphi %s363_s6, %s414_s6  }
   0x3   : > { %p35_p0 = scmp.ge.s32.totalorder %s33_s10, 6  ;;  %p291_p1 = scmp.ge.s32.totalorder %s350_s8, 6 }
   0x4   : > { %s49_s11 = sand.u32 (!%p291_p1), 1, %s350_s8   ;;  %s293_s12 = sshll.u32 (!%p291_p1), %s346_s7, 1 }
   0x5   : > { %s417_s10 = smov (%p35_p0, %s33_s10), 0  ;;  %47 = sbr.rel (%p291_p1) target bundleno = 12 (0xc), region = 16 }
   0x6   : > { %s292_s13 = sshll.u32 (!%p291_p1), %s49_s11, 1  ;;  %s56_s16 = scalar_lea.vmem (!%p291_p1), %s412_s0, %s293_s12 }
   0x7   : > { %s51_s17 = scalar_lea.vmem (!%p291_p1), [#allocation1], %s292_s13 }
   0xa   : > { %v73_v0 = vld [vmem:[%s56_s16] sm:$0x3] }
   0xb   : > { %74 = vst [vmem:[%s51_s17] sm:$0x3] %v73_v0 }
   0xc PF: > { %p294_p2 = scmp.ge.s32.totalorder %s350_s8, 1  ;;  %p91_p3 = scmp.lt.s32.totalorder %s350_s8, 7 }
   0xe   : > { %p92_p4 = pnand %p294_p2, %p91_p3 }
  0x10   : > { %95 = sbr.rel (%p92_p4) target bundleno = 318 (0x13e), region = 50 }
  0x15   : > { %s390_s18 = sand.u32 1, %s289_s9   ;;  %v113_v1 = vlaneseq  ;;  %v352_v20 = vmov -1.0   ;;  %s298_s22 = sshll.u32 %s342_s6, 1 }
  0x16   : > { %s295_s19 = sshll.u32 %s390_s18, 1  ;;  %s196_s25 = scalar_lea.vmem %s413_s1, %s298_s22 }
  0x17   : > { %s104_s20 = scalar_lea.vmem [#allocation1], %s295_s19  ;;  %v114_v3 = vand.u32 127, %v113_v1  ;;  %v117_v4 = vshrl.u32 %v113_v1, 7  ;;  %s108_s21 = scalar_lea.vmem [#allocation3], %s295_s19 }
  0x18   : > { %v111_v2 = vld [vmem:[%s104_s20] sm:$0x3] }
  0x19   : > { %112 = vst [vmem:[#allocation0] sm:$0x3] %v111_v2  ;;  %vm119_vm0 = vcmp.eq.s32.totalorder %v117_v4, %v114_v3  ;;  %vm115_vm1 = vcmp.lt.s32.totalorder %v114_v3, 2  ;;  %vm124_vm2 = vcmp.ge.s32.totalorder %v117_v4, %v114_v3  ;;  %vm151_vm8 = vcmp.eq.s32.totalorder %v114_v3, 0 }
  0x1a   : > { %vm125_vm3 = vmand %vm124_vm2, %vm115_vm1  ;;  %vm148_vm9 = vcmp.eq.s32.totalorder %v114_v3, %v117_v4  ;;  %v152_v21 = vsel %vm151_vm8, 1.0, %v352_v20  ;;  %vm159_vm10 = vcmp.eq.s32.totalorder %v114_v3, 1 }
  0x1b   : > { %v153_v22 = vsel %vm148_vm9, %v152_v21, 0.0 }
  0x20   : > { %v120_v5 = vld [vmem:[#allocation0] sm:$0xff] }
  0x21   : > { %v121_v6 = vsel %vm119_vm0, %v120_v5, 0.0  ;;  %v126_v15 = vsel %vm125_vm3, %v120_v5, 0.0 }
  0x22   : > { %122 = vadd.xlane.f32.xlu0 %v121_v6 }
  0x95   : > { %v123_v7 = vpop.xlane.xlu0 %122 }
  0x96   : > { %326 = vrcp.f32 %v123_v7  ;;  %v138_v11 = vand.u32 2147483648, %v123_v7  ;;  %v136_v13 = vand.u32 2147483647, %v123_v7  ;;  %vm132_vm5 = vweird.f32 %v123_v7 }
  0x98   : > { %v139_v16 = vor.u32 1.1754944e-38, %v138_v11  ;;  %vm137_vm7 = vcmp.eq.f32.partialorder %v136_v13, 8.507059e+37 }
  0x9c   : > { %v327_v8 = vpop.eup %326 }
  0x9d   : > { %v128_v9 = vmul.f32 %v327_v8, %v123_v7  ;;  %vm133_vm4 = vweird.f32 %v327_v8 }
  0x9e   : > { %vm134_vm6 = vmor %vm132_vm5, %vm133_vm4 }
  0x9f   : > { %v129_v10 = vsub.f32 1.0, %v128_v9 }
  0xa1   : > { %v130_v12 = vmul.f32 %v327_v8, %v129_v10 }
  0xa3   : > { %v131_v14 = vadd.f32 %v327_v8, %v130_v12 }
  0xa5   : > { %v135_v17 = vsel %vm134_vm6, %v327_v8, %v131_v14 }
  0xa6   : > { %v140_v18 = vsel %vm137_vm7, %v139_v16, %v135_v17 }
  0xa7   : > { %v141_v19 = vmul.f32 %v140_v18, %v126_v15 }
  0xa9   : > { %142 = vst [vmem:[#allocation4] sm:$0xff] %v141_v19 }
  0xb0   : > { %v155_v23 = vld [vmem:[#allocation4 + $0x1] ss:$0 sm:$0xff] }
  0xb1   : > { %v156_v24 = vxor.u32 2147483648, %v155_v23 }
  0xb3   : > { %v160_v25 = vmul.f32 %v156_v24, %v153_v22 }
  0xb5   : > { %161 = vadd.xlane.f32.xlu0 %v160_v25 }
 0x128   : > { %v162_v26 = vpop.xlane.xlu0 %161 }
 0x129   : > { %v163_v27 = vsel %vm159_vm10, %v162_v26, %v153_v22 }
 0x12a   : > { %v178_v28 = vmul.f32 %v163_v27, %v140_v18 }
 0x12c   : > { %v180_v29 = vsel %vm132_vm5, %v163_v27, %v178_v28 }
 0x12d   : > { %181 = vst [vmem:[#allocation2] sm:$0xff] %v180_v29 }
 0x134   : > { %v184_v30 = vld [vmem:[#allocation2] sm:$0x3] }
 0x135   : > { %187 = vst [vmem:[%s108_s21] sm:$0x3] %v184_v30 }
 0x13c   : > { %v213_v31 = vld [vmem:[%s108_s21] sm:$0x3] }
 0x13d   : > { %214 = vst [vmem:[%s196_s25] sm:$0x3] %v213_v31 }
 0x13e PF: > { %s7_s8 = sadd.s32 1, %s350_s8   ;;  %s414_s6 = smov %s346_s7 }
 0x13f   : > { %p4_p5 = scmp.ge.s32.totalorder %s7_s8, 8   ;;  %s415_s7 = smov %s417_s10 }
 0x141   :  { %6 = sbr.rel (!%p4_p5) target bundleno = 2 (0x2), region = 111 }

// kernel: custom-call.12
= control target key start
LH: loop header
LB: loop body
LE: loop exit
PB: predicated region body
PF: predicated region fallthrough
CT: control target
= control target key end

     0   :  { %s362_s6 = smov 0   ;;  %s364_s7 = smov 0   ;;  %s411_s0 = inlined_call_operand.vmem [shape: f32[6,1,2,2], index: 0, kind: input, shape index: {}]   ;;  %s412_s1 = inlined_call_operand.vmem [shape: f32[6,1,2,2], index: 1, kind: output, shape index: {}]  }
   0x1   :  { %s366_s8 = smov 0  }
   0x2 LB: > { %s288_s9 = sadd.s32 4294967295, %s349_s8   ;;  %s33_s10 = sadd.s32 1, %s345_s7  ;;  %s349_s8 = sphi %s366_s8, %s7_s8   ;;  %s345_s7 = sphi %s364_s7, %s414_s7   ;;  %s341_s6 = sphi %s362_s6, %s413_s6  }
   0x3   : > { %p35_p0 = scmp.ge.s32.totalorder %s33_s10, 6  ;;  %p290_p1 = scmp.ge.s32.totalorder %s349_s8, 6 }
   0x4   : > { %s49_s11 = sand.u32 (!%p290_p1), 1, %s349_s8   ;;  %s292_s12 = sshll.u32 (!%p290_p1), %s345_s7, 1 }
   0x5   : > { %s416_s10 = smov (%p35_p0, %s33_s10), 0  ;;  %47 = sbr.rel (%p290_p1) target bundleno = 12 (0xc), region = 16 }
   0x6   : > { %s291_s13 = sshll.u32 (!%p290_p1), %s49_s11, 1  ;;  %s56_s16 = scalar_lea.vmem (!%p290_p1), %s411_s0, %s292_s12 }
   0x7   : > { %s51_s17 = scalar_lea.vmem (!%p290_p1), [#allocation1], %s291_s13 }
   0xa   : > { %v73_v0 = vld [vmem:[%s56_s16] sm:$0x3] }
   0xb   : > { %74 = vst [vmem:[%s51_s17] sm:$0x3] %v73_v0 }
   0xc PF: > { %p293_p2 = scmp.ge.s32.totalorder %s349_s8, 1  ;;  %p91_p3 = scmp.lt.s32.totalorder %s349_s8, 7 }
   0xe   : > { %p92_p4 = pnand %p293_p2, %p91_p3 }
  0x10   : > { %95 = sbr.rel (%p92_p4) target bundleno = 318 (0x13e), region = 50 }
  0x15   : > { %s389_s18 = sand.u32 1, %s288_s9   ;;  %v113_v1 = vlaneseq  ;;  %v351_v20 = vmov -1.0   ;;  %s297_s22 = sshll.u32 %s341_s6, 1 }
  0x16   : > { %s294_s19 = sshll.u32 %s389_s18, 1  ;;  %s195_s25 = scalar_lea.vmem %s412_s1, %s297_s22 }
  0x17   : > { %s104_s20 = scalar_lea.vmem [#allocation1], %s294_s19  ;;  %v114_v3 = vand.u32 127, %v113_v1  ;;  %v117_v4 = vshrl.u32 %v113_v1, 7  ;;  %s108_s21 = scalar_lea.vmem [#allocation3], %s294_s19 }
  0x18   : > { %v111_v2 = vld [vmem:[%s104_s20] sm:$0x3] }
  0x19   : > { %112 = vst [vmem:[#allocation0] sm:$0x3] %v111_v2  ;;  %vm119_vm0 = vcmp.eq.s32.totalorder %v117_v4, %v114_v3  ;;  %vm115_vm1 = vcmp.lt.s32.totalorder %v114_v3, 2  ;;  %vm124_vm2 = vcmp.le.s32.totalorder %v117_v4, %v114_v3  ;;  %vm151_vm8 = vcmp.eq.s32.totalorder %v114_v3, 1 }
  0x1a   : > { %vm125_vm3 = vmand %vm124_vm2, %vm115_vm1  ;;  %vm148_vm9 = vcmp.eq.s32.totalorder %v114_v3, %v117_v4  ;;  %v152_v21 = vsel %vm151_vm8, 1.0, %v351_v20  ;;  %vm158_vm10 = vcmp.eq.s32.totalorder %v114_v3, 0 }
  0x1b   : > { %v153_v22 = vsel %vm148_vm9, %v152_v21, 0.0 }
  0x20   : > { %v120_v5 = vld [vmem:[#allocation0] sm:$0xff] }
  0x21   : > { %v121_v6 = vsel %vm119_vm0, %v120_v5, 0.0  ;;  %v126_v15 = vsel %vm125_vm3, %v120_v5, 0.0 }
  0x22   : > { %122 = vadd.xlane.f32.xlu0 %v121_v6 }
  0x95   : > { %v123_v7 = vpop.xlane.xlu0 %122 }
  0x96   : > { %325 = vrcp.f32 %v123_v7  ;;  %v138_v11 = vand.u32 2147483648, %v123_v7  ;;  %v136_v13 = vand.u32 2147483647, %v123_v7  ;;  %vm132_vm5 = vweird.f32 %v123_v7 }
  0x98   : > { %v139_v16 = vor.u32 1.1754944e-38, %v138_v11  ;;  %vm137_vm7 = vcmp.eq.f32.partialorder %v136_v13, 8.507059e+37 }
  0x9c   : > { %v326_v8 = vpop.eup %325 }
  0x9d   : > { %v128_v9 = vmul.f32 %v326_v8, %v123_v7  ;;  %vm133_vm4 = vweird.f32 %v326_v8 }
  0x9e   : > { %vm134_vm6 = vmor %vm132_vm5, %vm133_vm4 }
  0x9f   : > { %v129_v10 = vsub.f32 1.0, %v128_v9 }
  0xa1   : > { %v130_v12 = vmul.f32 %v326_v8, %v129_v10 }
  0xa3   : > { %v131_v14 = vadd.f32 %v326_v8, %v130_v12 }
  0xa5   : > { %v135_v17 = vsel %vm134_vm6, %v326_v8, %v131_v14 }
  0xa6   : > { %v140_v18 = vsel %vm137_vm7, %v139_v16, %v135_v17 }
  0xa7   : > { %v141_v19 = vmul.f32 %v140_v18, %v126_v15 }
  0xa9   : > { %142 = vst [vmem:[#allocation4] sm:$0xff] %v141_v19 }
  0xb0   : > { %v154_v23 = vld [vmem:[#allocation4] ss:$0 sm:$0xff] }
  0xb1   : > { %v155_v24 = vxor.u32 2147483648, %v154_v23 }
  0xb3   : > { %v159_v25 = vmul.f32 %v155_v24, %v153_v22 }
  0xb5   : > { %160 = vadd.xlane.f32.xlu0 %v159_v25 }
 0x128   : > { %v161_v26 = vpop.xlane.xlu0 %160 }
 0x129   : > { %v162_v27 = vsel %vm158_vm10, %v161_v26, %v153_v22 }
 0x12a   : > { %v177_v28 = vmul.f32 %v162_v27, %v140_v18 }
 0x12c   : > { %v179_v29 = vsel %vm132_vm5, %v162_v27, %v177_v28 }
 0x12d   : > { %180 = vst [vmem:[#allocation2] sm:$0xff] %v179_v29 }
 0x134   : > { %v183_v30 = vld [vmem:[#allocation2] sm:$0x3] }
 0x135   : > { %186 = vst [vmem:[%s108_s21] sm:$0x3] %v183_v30 }
 0x13c   : > { %v212_v31 = vld [vmem:[%s108_s21] sm:$0x3] }
 0x13d   : > { %213 = vst [vmem:[%s195_s25] sm:$0x3] %v212_v31 }
 0x13e PF: > { %s7_s8 = sadd.s32 1, %s349_s8   ;;  %s413_s6 = smov %s345_s7 }
 0x13f   : > { %p4_p5 = scmp.ge.s32.totalorder %s7_s8, 8   ;;  %s414_s7 = smov %s416_s10 }
 0x141   :  { %6 = sbr.rel (!%p4_p5) target bundleno = 2 (0x2), region = 110 }

// kernel: gmm_prob_pallas.1
= control target key start
LH: loop header
LB: loop body
LE: loop exit
PB: predicated region body
PF: predicated region fallthrough
CT: control target
= control target key end

     0   :  { %10 = vsyncpa [#allocation3], 0  ;;  %s498_s0 = inlined_call_operand.vmem [shape: f32[6,2], index: 0, kind: input, shape index: {}]   ;;  %s499_s1 = inlined_call_operand.vmem [shape: f32[6,3], index: 1, kind: input, shape index: {}]   ;;  %s500_s2 = inlined_call_operand.vmem [shape: f32[6], index: 2, kind: input, shape index: {}]   ;;  %s501_s3 = inlined_call_operand.vmem [shape: f32[6], index: 3, kind: input, shape index: {}]   ;;  %s502_s4 = inlined_call_operand.vmem [shape: f32[2,8,128], index: 4, kind: input, shape index: {}]   ;;  %s503_s5 = inlined_call_operand.vmem [shape: f32[8,128], index: 5, kind: output, shape index: {}]  }
   0x1   :  { %11 = vsyncpa [#allocation5], 0  ;;  %s27_s20 = sshll.u32 %s499_s1, 4  ;;  %s28_s20 = int_to_ptr.vmem [resolvable:$true] %s27_s20 }
   0x2   :  { %12 = vsyncpa [#allocation8], 0  ;;  %s18_s23 = sshll.u32 %s498_s0, 4  ;;  %s361_s24 = smov [#allocation4]   ;;  %s19_s23 = int_to_ptr.vmem [resolvable:$true] %s18_s23 }
   0x3   :  { %30 = dma.vmem_to_smem %s28_s20, 128, %s361_s24, [#allocation5]  }
   0x4   :  { %s362_s25 = smov [#allocation2]   ;;  %s36_s28 = sshll.u32 %s500_s2, 4  ;;  %s37_s28 = int_to_ptr.vmem [resolvable:$true] %s36_s28 }
   0x5   :  { %21 = dma.vmem_to_smem %s19_s23, 128, %s362_s25, [#allocation3]  }
   0x6   :  { %s45_s1 = sshll.u32 %s501_s3, 4  ;;  %s363_s6 = smov [#allocation6]   ;;  %s46_s1 = int_to_ptr.vmem [resolvable:$true] %s45_s1 }
   0x7   :  { %39 = dma.vmem_to_smem %s37_s28, 16, %s363_s6, [#allocation5]  }
   0x8   :  { %s364_s7 = smov [#allocation7]  }
   0x9   :  { %48 = dma.vmem_to_smem %s46_s1, 16, %s364_s7, [#allocation8]  }
   0xa   :  { %355 = dma.done.wait [#allocation3], 128  }
   0xb   :  { %356 = vsyncadd [#allocation3], 4294967168 }
   0xc   :  { %357 = dma.done.wait [#allocation5], 144  }
   0xd   :  { %358 = vsyncadd [#allocation5], 4294967152 }
   0xe   :  { %359 = dma.done.wait [#allocation8], 16  }
   0xf   :  { %360 = vsyncadd [#allocation8], 4294967280 }
  0x10   :  { %67 = sfence }
  0x11   :  { %s71_s0 = sld [smem:[#allocation2]]  ;;  %v410_v0 = vld [vmem:[%s502_s4] sm:$0xff]  ;;  %v415_v1 = vld [vmem:[%s502_s4 + $0x8] sm:$0xff] }
  0x12   :  { %s253_s8 = sld [smem:[#allocation2 + $0x1]] }
  0x13   :  { %s77_s2 = sld [smem:[#allocation4]] }
  0x14   :  { %s254_s3 = sld [smem:[#allocation4 + $0x1]] }
  0x15   :  { %s417_s13 = sld [smem:[#allocation4 + $0x2]] }
  0x16   :  { %s256_s14 = sld [smem:[#allocation2 + $0x80]] }
  0x17   :  { %v72_v2 = vstv %s71_s0  ;;  %s257_s15 = sld [smem:[#allocation2 + $0x81]] }
  0x18   :  { %v73_v3 = vsub.f32 %v410_v0, %v72_v2  ;;  %v75_v4 = vstv %s253_s8  ;;  %s258_s16 = sld [smem:[#allocation4 + $0x80]] }
  0x19   :  { %v76_v5 = vsub.f32 %v415_v1, %v75_v4  ;;  %s421_s17 = sld [smem:[#allocation4 + $0x81]]  ;;  %v79_v8 = vstv %s77_s2 }
  0x1a   :  { %v78_v6 = vmul.f32 %v73_v3, %v73_v3  ;;  %s260_s18 = sld [smem:[#allocation4 + $0x82]]  ;;  %v83_v9 = vstv %s254_s3 }
  0x1b   :  { %v82_v7 = vmul.f32 %v76_v5, %v73_v3  ;;  %s423_s4 = sld [smem:[#allocation6]]  ;;  %v87_v11 = vmul.f32 %v76_v5, %v76_v5  ;;  %v88_v18 = vstv %s417_s13 }
  0x1c   :  { %v100_v10 = vstv %s256_s14  ;;  %s425_s19 = sld [smem:[#allocation6 + $0x1]]  ;;  %v80_v14 = vmul.f32 %v79_v8, %v78_v6 }
  0x1d   :  { %v101_v12 = vsub.f32 %v410_v0, %v100_v10  ;;  %v103_v13 = vstv %s257_s15  ;;  %s263_s20 = sld [smem:[#allocation2 + $0x100]]  ;;  %v84_v15 = vmul.f32 %v83_v9, %v82_v7  ;;  %v89_v26 = vmul.f32 %v88_v18, %v87_v11 }
  0x1e   :  { %v104_v16 = vsub.f32 %v415_v1, %v103_v13  ;;  %v107_v17 = vstv %s258_s16  ;;  %s264_s21 = sld [smem:[#allocation2 + $0x101]] }
  0x1f   :  { %v106_v19 = vmul.f32 %v101_v12, %v101_v12  ;;  %v111_v20 = vstv %s421_s17  ;;  %s431_s22 = sld [smem:[#allocation4 + $0x100]]  ;;  %v85_v25 = vadd.f32 %v84_v15, %v80_v14 }
  0x20   :  { %v110_v21 = vmul.f32 %v104_v16, %v101_v12  ;;  %v115_v22 = vmul.f32 %v104_v16, %v104_v16  ;;  %v116_v23 = vstv %s260_s18  ;;  %s433_s23 = sld [smem:[#allocation4 + $0x101]] }
  0x21   :  { %v108_v24 = vmul.f32 %v107_v17, %v106_v19  ;;  %s267_s24 = sld [smem:[#allocation4 + $0x102]]  ;;  %v90_v35 = vadd.f32 %v89_v26, %v85_v25  ;;  %v92_v36 = vstv %s423_s4 }
  0x22   :  { %s435_s25 = sld [smem:[#allocation7]]  ;;  %v112_v27 = vmul.f32 %v111_v20, %v110_v21  ;;  %v117_v28 = vmul.f32 %v116_v23, %v115_v22  ;;  %v120_v43 = vstv %s425_s19 }
  0x23   :  { %v129_v29 = vstv %s263_s20  ;;  %s437_s26 = sld [smem:[#allocation6 + $0x2]]  ;;  %v93_v47 = vadd.f32 %v92_v36, %v90_v35 }
  0x24   :  { %v113_v30 = vadd.f32 %v112_v27, %v108_v24  ;;  %v130_v31 = vsub.f32 %v410_v0, %v129_v29  ;;  %v132_v32 = vstv %s264_s21  ;;  %s270_s27 = sld [smem:[#allocation2 + $0x180]] }
  0x25   :  { %v133_v33 = vsub.f32 %v415_v1, %v132_v32  ;;  %v136_v34 = vstv %s431_s22  ;;  %s271_s28 = sld [smem:[#allocation2 + $0x181]]  ;;  %v95_v59 = vmul.f32 1.442695, %v93_v47 }
  0x26   :  { %v135_v37 = vmul.f32 %v130_v31, %v130_v31  ;;  %v140_v38 = vstv %s433_s23  ;;  %s444_s29 = sld [smem:[#allocation4 + $0x180]]  ;;  %v118_v39 = vadd.f32 %v117_v28, %v113_v30 }
  0x27   :  { %v139_v40 = vmul.f32 %v133_v33, %v130_v31  ;;  %v144_v41 = vmul.f32 %v133_v33, %v133_v33  ;;  %v145_v42 = vstv %s267_s24  ;;  %s446_s30 = sld [smem:[#allocation4 + $0x181]]  ;;  %295 = vpow2.f32 %v95_v59 }
  0x28   :  { %v137_v44 = vmul.f32 %v136_v34, %v135_v37  ;;  %s449_s1 = sld [smem:[#allocation4 + $0x182]]  ;;  %v121_v49 = vadd.f32 %v120_v43, %v118_v39  ;;  %v97_v28 = vstv %s435_s25 }
  0x29   :  { %s451_s6 = sld [smem:[#allocation7 + $0x1]]  ;;  %v141_v45 = vmul.f32 %v140_v38, %v139_v40  ;;  %v146_v46 = vmul.f32 %v145_v42, %v144_v41  ;;  %v149_v56 = vstv %s437_s26 }
  0x2a   :  { %v158_v48 = vstv %s270_s27  ;;  %s453_s7 = sld [smem:[#allocation6 + $0x3]]  ;;  %v123_v63 = vmul.f32 1.442695, %v121_v49 }
  0x2b   :  { %v142_v50 = vadd.f32 %v141_v45, %v137_v44  ;;  %v159_v51 = vsub.f32 %v410_v0, %v158_v48  ;;  %v161_v52 = vstv %s271_s28  ;;  %s277_s0 = sld [smem:[#allocation2 + $0x200]] }
  0x2c   :  { %v162_v53 = vsub.f32 %v415_v1, %v161_v52  ;;  %v165_v54 = vstv %s444_s29  ;;  %s278_s8 = sld [smem:[#allocation2 + $0x201]]  ;;  %297 = vpow2.f32 %v123_v63 }
  0x2d   :  { %v147_v55 = vadd.f32 %v146_v46, %v142_v50  ;;  %v164_v57 = vmul.f32 %v159_v51, %v159_v51  ;;  %v169_v58 = vstv %s446_s30  ;;  %s460_s2 = sld [smem:[#allocation4 + $0x200]]  ;;  %v296_v24 = vpop.eup %295 }
  0x2e   :  { %v168_v60 = vmul.f32 %v162_v53, %v159_v51  ;;  %v173_v61 = vmul.f32 %v162_v53, %v162_v53  ;;  %v174_v62 = vstv %s449_s1  ;;  %s463_s9 = sld [smem:[#allocation4 + $0x201]] }
  0x2f   :  { %v166_v2 = vmul.f32 %v165_v54, %v164_v57  ;;  %s281_s10 = sld [smem:[#allocation4 + $0x202]]  ;;  %v150_v3 = vadd.f32 %v149_v56, %v147_v55  ;;  %v125_v32 = vstv %s451_s6 }
  0x30   :  { %s465_s3 = sld [smem:[#allocation7 + $0x2]]  ;;  %v170_v4 = vmul.f32 %v169_v58, %v168_v60  ;;  %v175_v5 = vmul.f32 %v174_v62, %v173_v61  ;;  %v178_v10 = vstv %s453_s7 }
  0x31   :  { %v187_v6 = vstv %s277_s0  ;;  %s467_s11 = sld [smem:[#allocation6 + $0x4]]  ;;  %v152_v13 = vmul.f32 1.442695, %v150_v3 }
  0x32   :  { %v171_v7 = vadd.f32 %v170_v4, %v166_v2  ;;  %v188_v8 = vsub.f32 %v410_v0, %v187_v6  ;;  %v190_v9 = vstv %s278_s8  ;;  %s284_s12 = sld [smem:[#allocation2 + $0x280]]  ;;  %v298_v27 = vpop.eup %297 }
  0x33   :  { %v191_v11 = vsub.f32 %v415_v1, %v190_v9  ;;  %v194_v12 = vstv %s460_s2  ;;  %s285_s13 = sld [smem:[#allocation2 + $0x281]]  ;;  %299 = vpow2.f32 %v152_v13  ;;  %v126_v42 = vmul.f32 %v298_v27, %v125_v32 }
  0x34   :  { %v176_v14 = vadd.f32 %v175_v5, %v171_v7  ;;  %v193_v15 = vmul.f32 %v188_v8, %v188_v8  ;;  %v198_v16 = vstv %s463_s9  ;;  %s474_s14 = sld [smem:[#allocation4 + $0x280]] }
  0x35   :  { %v197_v17 = vmul.f32 %v191_v11, %v188_v8  ;;  %v202_v18 = vmul.f32 %v191_v11, %v191_v11  ;;  %v203_v19 = vstv %s281_s10  ;;  %s476_s15 = sld [smem:[#allocation4 + $0x281]] }
  0x36   :  { %v179_v20 = vadd.f32 %v178_v10, %v176_v14  ;;  %v195_v21 = vmul.f32 %v194_v12, %v193_v15  ;;  %s478_s16 = sld [smem:[#allocation4 + $0x282]]  ;;  %v154_v46 = vstv %s465_s3 }
  0x37   :  { %v199_v22 = vmul.f32 %v198_v16, %v197_v17  ;;  %v204_v23 = vmul.f32 %v203_v19, %v202_v18  ;;  %s482_s17 = sld [smem:[#allocation6 + $0x5]]  ;;  %v207_v33 = vstv %s467_s11 }
  0x38   :  { %v181_v25 = vmul.f32 1.442695, %v179_v20  ;;  %v216_v26 = vstv %s284_s12  ;;  %s485_s18 = sld [smem:[#allocation7 + $0x3]] }
  0x39   :  { %v200_v29 = vadd.f32 %v199_v22, %v195_v21  ;;  %v217_v30 = vsub.f32 %v410_v0, %v216_v26  ;;  %v219_v31 = vstv %s285_s13  ;;  %v98_v0 = vmul.f32 %v296_v24, %v97_v28  ;;  %v300_v45 = vpop.eup %299  ;;  %s283_s4 = sld [smem:[#allocation7 + $0x4]] }
  0x3a   :  { %v220_v34 = vsub.f32 %v415_v1, %v219_v31  ;;  %v223_v35 = vstv %s474_s14  ;;  %301 = vpow2.f32 %v181_v25  ;;  %v155_v51 = vmul.f32 %v300_v45, %v154_v46  ;;  %s290_s19 = sld [smem:[#allocation7 + $0x5]] }
  0x3b   :  { %v205_v36 = vadd.f32 %v204_v23, %v200_v29  ;;  %v222_v37 = vmul.f32 %v217_v30, %v217_v30  ;;  %v227_v38 = vstv %s476_s15  ;;  %v127_v50 = vadd.f32 %v126_v42, %v98_v0 }
  0x3c   :  { %v226_v39 = vmul.f32 %v220_v34, %v217_v30  ;;  %v231_v40 = vmul.f32 %v220_v34, %v220_v34  ;;  %v232_v41 = vstv %s478_s16 }
  0x3d   :  { %v208_v43 = vadd.f32 %v207_v33, %v205_v36  ;;  %v224_v44 = vmul.f32 %v223_v35, %v222_v37  ;;  %v236_v52 = vstv %s482_s17  ;;  %v156_v57 = vadd.f32 %v155_v51, %v127_v50 }
  0x3e   :  { %v228_v47 = vmul.f32 %v227_v38, %v226_v39  ;;  %v233_v48 = vmul.f32 %v232_v41, %v231_v40  ;;  %v183_v54 = vstv %s485_s18 }
  0x3f   :  { %v210_v1 = vmul.f32 1.442695, %v208_v43  ;;  %v212_v59 = vstv %s283_s4 }
  0x40   :  { %v229_v49 = vadd.f32 %v228_v47, %v224_v44  ;;  %v302_v53 = vpop.eup %301  ;;  %v241_v2 = vstv %s290_s19 }
  0x41   :  { %303 = vpow2.f32 %v210_v1  ;;  %v184_v58 = vmul.f32 %v302_v53, %v183_v54 }
  0x42   :  { %v234_v55 = vadd.f32 %v233_v48, %v229_v49 }
  0x43   :  { %v185_v62 = vadd.f32 %v184_v58, %v156_v57 }
  0x44   :  { %v237_v56 = vadd.f32 %v236_v52, %v234_v55 }
  0x46   :  { %v239_v60 = vmul.f32 1.442695, %v237_v56 }
  0x47   :  { %v304_v61 = vpop.eup %303 }
  0x48   :  { %305 = vpow2.f32 %v239_v60  ;;  %v213_v63 = vmul.f32 %v304_v61, %v212_v59 }
  0x4a   :  { %v214_v3 = vadd.f32 %v213_v63, %v185_v62 }
  0x4e   :  { %v306_v4 = vpop.eup %305 }
  0x4f   :  { %v242_v5 = vmul.f32 %v306_v4, %v241_v2 }
  0x51   :  { %v243_v6 = vadd.f32 %v242_v5, %v214_v3 }
  0x53   :  { %244 = vst [vmem:[%s503_s5] sm:$0xff] %v243_v6 }
  0x54   :  { %249 = vsyncpa [#allocation3], 1 }
  0x55   :  { %250 = vsyncpa [#allocation5], 1 }
  0x56   :  { %251 = vsyncpa [#allocation8], 1 }

</bundles_post_ra>
